<compile_context>
chip_gen: v7x
topology: tpu7x:2x2x1
jax: 0.10.0
libtpu: 0.0.40
codegen_flags: <defaults>
</compile_context>

<pallas_src>
import functools

import numpy as np
import jax
import jax.numpy as jnp
from jax.experimental import pallas as pl
from jax.experimental.pallas import tpu as pltpu


def _round_up(x, m):
    return (x + m - 1) // m * m


# ----------------------------------------------------------------------------
# Kernel 1: tiled matmul + bias (+ optional gelu)
#   x (M, K) bf16  @  w (K, N) bf16  -> f32 accumulate -> + bias (f32)
#   grid = (M//tm, N//tn, K//tk), accumulator scratch in VMEM, K axis last.
# ----------------------------------------------------------------------------
def _matmul_bias_kernel(x_ref, w_ref, b_ref, o_ref, acc_ref, *, apply_gelu):
    k = pl.program_id(2)

    @pl.when(k == 0)
    def _():
        acc_ref[...] = jnp.zeros_like(acc_ref)

    acc_ref[...] += jnp.dot(x_ref[...], w_ref[...],
                            preferred_element_type=jnp.float32)

    @pl.when(k == pl.num_programs(2) - 1)
    def _():
        z = acc_ref[...] + b_ref[...].astype(jnp.float32)
        if apply_gelu:
            z = jax.nn.gelu(z, approximate=True)    # elementwise kept in f32
        o_ref[...] = z.astype(o_ref.dtype)


def tiled_matmul_bias(x, w, b, *, apply_gelu=False,
                      tm=256, tn=256, tk=256, out_dtype=jnp.float32):
    """y = act(x @ w + b), tiled & pipelined, bf16 MXU operands / f32 acc."""
    M, K = x.shape
    Kw, N = w.shape
    assert K == Kw
    # MXU-friendly tiles (256-multiples), clamped so toy shapes still work.
    tm = min(tm, _round_up(M, 8))
    tn = min(tn, _round_up(N, 128))
    tk = min(tk, _round_up(K, 128))
    Mp, Kp, Np = _round_up(M, tm), _round_up(K, tk), _round_up(N, tn)

    xp = jnp.zeros((Mp, Kp), jnp.bfloat16).at[:M, :K].set(x.astype(jnp.bfloat16))
    wp = jnp.zeros((Kp, Np), jnp.bfloat16).at[:K, :N].set(w.astype(jnp.bfloat16))
    bp = jnp.zeros((1, Np), jnp.float32).at[:, :N].set(
        b.reshape(1, N).astype(jnp.float32))

    grid = (Mp // tm, Np // tn, Kp // tk)
    # VMEM budget: double-buffered bf16 inputs + f32 bias + f32 output + f32 acc.
    need = 2 * (tm * tk * 2 + tk * tn * 2 + tn * 4 + tm * tn * 4) + tm * tn * 4
    vmem_limit = int(min(max(need + (8 << 20), 16 << 20), 56 << 20))  # <= 64MiB (v7x)

    out = pl.pallas_call(
        functools.partial(_matmul_bias_kernel, apply_gelu=apply_gelu),
        out_shape=jax.ShapeDtypeStruct((Mp, Np), out_dtype),
        grid_spec=pltpu.PrefetchScalarGridSpec(
            num_scalar_prefetch=0,
            grid=grid,
            in_specs=[pl.BlockSpec((tm, tk), lambda i, j, k: (i, k)),
                      pl.BlockSpec((tk, tn), lambda i, j, k: (k, j)),
                      pl.BlockSpec((1, tn), lambda i, j, k: (0, j))],
            out_specs=pl.BlockSpec((tm, tn), lambda i, j, k: (i, j)),
            scratch_shapes=[pltpu.VMEM((tm, tn), jnp.float32)]),
        compiler_params=pltpu.CompilerParams(
            dimension_semantics=("parallel", "parallel", "arbitrary"),
            vmem_limit_bytes=vmem_limit),
    )(xp, wp, bp)
    return out[:M, :N]


# ----------------------------------------------------------------------------
# Kernel 2: verbalizer — one call covering all tasks (grid over tasks).
#   inputs:  mask_logits (T, B, V) f32  (LM-head output at mask positions only)
#            ids (T, 1, CWp) int32      flattened class-major label-word ids
#            avg (T, CWp, C_PAD) f32    word->class averaging weights (1/W)
#   per task: gather the C*W label-word logits with an in-register one-hot
#             (iota == ids) + single MXU dot, softmax over them,
#             log(p + 1e-15) (exact PyTorch semantics), per-class mean via a
#             small dot, write a lane-dense (B, C_PAD=128) block.
# ----------------------------------------------------------------------------
def _verbalizer_kernel(logits_ref, ids_ref, avg_ref, out_ref):
    logits = logits_ref[0]                                     # (B, V) f32
    ids = ids_ref[0]                                           # (1, CWp) int32
    v = logits.shape[-1]
    cw_pad = ids.shape[-1]

    # One-hot selection matrix built entirely in registers (no dense V x CW
    # matrix DMA'd from HBM); the gather of all label-word columns is one dot.
    iota_v = jax.lax.broadcasted_iota(jnp.int32, (v, cw_pad), 0)
    onehot = (iota_v == ids).astype(jnp.float32)               # (V, CWp)
    lw = jnp.dot(logits, onehot, preferred_element_type=jnp.float32)  # (B, CWp)
    lw = jnp.where(ids >= 0, lw, jnp.float32(-1e30))           # mask padded words

    # softmax over the flattened label words, then log(p + 1e-15) exactly as
    # in the PyTorch verbalizer.
    m = jnp.max(lw, axis=-1, keepdims=True)
    e = jnp.exp(lw - m)
    s = jnp.sum(e, axis=-1, keepdims=True)
    p = e / s
    logp = jnp.log(p + jnp.float32(1e-15))                     # (B, CWp)

    # per-class mean over words: (B, CWp) @ (CWp, C_PAD); padded words carry
    # zero averaging weight so their finite log(1e-15) never contributes.
    out_ref[0] = jnp.dot(logp, avg_ref[0], preferred_element_type=jnp.float32)


def verbalizer_pallas(mask_logits, ids_pad, avg):
    T, B, V = mask_logits.shape
    cw_pad = ids_pad.shape[-1]
    c_pad = avg.shape[-1]
    return pl.pallas_call(
        _verbalizer_kernel,
        out_shape=jax.ShapeDtypeStruct((T, B, c_pad), jnp.float32),
        grid_spec=pltpu.PrefetchScalarGridSpec(
            num_scalar_prefetch=0,
            grid=(T,),
            in_specs=[pl.BlockSpec((1, B, V), lambda t: (t, 0, 0)),
                      pl.BlockSpec((1, 1, cw_pad), lambda t: (t, 0, 0)),
                      pl.BlockSpec((1, cw_pad, c_pad), lambda t: (t, 0, 0))],
            out_specs=pl.BlockSpec((1, B, c_pad), lambda t: (t, 0, 0))),
        compiler_params=pltpu.CompilerParams(
            dimension_semantics=("parallel",)),
    )(mask_logits, ids_pad, avg)


def _pack_verbalizer(label_word_ids, c_pad=128):
    """Pad per-task label-word ids / class-averaging weights to common shapes."""
    tasks = list(label_word_ids.keys())
    T = len(tasks)
    cw_sizes = [len(label_word_ids[t]) * len(label_word_ids[t][0]) for t in tasks]
    cw_pad = max(8, _round_up(max(cw_sizes), 8))
    ids_pad = np.full((T, 1, cw_pad), -1, np.int32)
    avg = np.zeros((T, cw_pad, c_pad), np.float32)
    for ti, t in enumerate(tasks):
        ids = np.asarray(label_word_ids[t], np.int32)          # (C, W)
        C, W = ids.shape
        ids_pad[ti, 0, :C * W] = ids.reshape(-1)               # class-major flatten
        for c in range(C):
            avg[ti, c * W:(c + 1) * W, c] = 1.0 / W
    return jnp.asarray(ids_pad), jnp.asarray(avg)


# ----------------------------------------------------------------------------
# MultiMaskitModel forward (wrapper glue)
# ----------------------------------------------------------------------------
def multi_maskit_forward(params, input_ids, attention_mask, mask_token_ids,
                         label_word_ids):
    # Synthetic backbone front: embedding lookup + attention-mask zeroing (glue).
    # TODO(synk): the real HF MaskedLM backbone (multi-layer transformer) is
    # stood in for by a single dense+gelu layer + LM head, as before.
    emb = jnp.take(params["emb"], input_ids, axis=0)           # (B, S, H)
    hidden = emb * attention_mask[..., None].astype(emb.dtype)
    B, S, H = hidden.shape

    # Kernel 1: dense + gelu over all positions (tiled bf16 matmul, f32 acc).
    z = tiled_matmul_bias(hidden.reshape(B * S, H), params["w1"], params["b1"],
                          apply_gelu=True)                     # (B*S, H) f32

    # Gather the mask-position rows for every task BEFORE the LM head so the
    # (B, S, V) logits tensor is never written to / re-read from HBM.
    tasks = list(label_word_ids.keys())
    T = len(tasks)
    rows = jnp.stack([jnp.arange(B, dtype=jnp.int32) * S + mask_token_ids[t]
                      for t in tasks]).reshape(-1)             # (T*B,)
    z_mask = jnp.take(z, rows, axis=0)                         # (T*B, H)

    # Kernel 1 again: LM head only on the T*B mask rows.
    V = params["wlm"].shape[1]
    mask_logits = tiled_matmul_bias(z_mask, params["wlm"], params["blm"],
                                    apply_gelu=False)          # (T*B, V) f32
    mask_logits = mask_logits.reshape(T, B, V)

    # Kernel 2: one verbalizer call over all tasks, lane-dense padded output.
    ids_pad, avg = _pack_verbalizer(label_word_ids)
    out_all = verbalizer_pallas(mask_logits, ids_pad, avg)     # (T, B, 128)

    output = {t: out_all[ti, :, :len(label_word_ids[t])]       # slice valid C
              for ti, t in enumerate(tasks)}
    return output, mask_logits


# ----------------------------------------------------------------------------
# Pure-JAX reference (mirrors the PyTorch semantics; same bf16 MXU operand path)
# ----------------------------------------------------------------------------
def ref_forward(params, input_ids, attention_mask, mask_token_ids,
                label_word_ids):
    emb = jnp.take(params["emb"], input_ids, axis=0)
    hidden = emb * attention_mask[..., None].astype(emb.dtype)
    z = jnp.dot(hidden.astype(jnp.bfloat16), params["w1"].astype(jnp.bfloat16),
                preferred_element_type=jnp.float32) + params["b1"][0]
    z = jax.nn.gelu(z, approximate=True)
    logits = jnp.dot(z.astype(jnp.bfloat16), params["wlm"].astype(jnp.bfloat16),
                     preferred_element_type=jnp.float32) + params["blm"][0]
    B = logits.shape[0]
    out = {}
    for task, ids in label_word_ids.items():
        lw = logits[jnp.arange(B), mask_token_ids[task]]       # (B, V)
        lw = lw[:, jnp.asarray(ids)]                           # (B, C, W)
        C, W = lw.shape[1], lw.shape[2]
        p = jax.nn.softmax(lw.reshape(B, -1), axis=-1).reshape(B, C, W)
        logp = jnp.log(p + 1e-15)
        out[task] = logp.sum(-1) / jnp.ones_like(logp).sum(-1) # (B, C)
    return out, logits


# ----------------------------------------------------------------------------
if __name__ == "__main__":
    B, S, H, V = 2, 8, 32, 128
    SPECIAL_IDS = (0, 1, 2, 3)  # analogous to tokenizer.all_special_ids

    key = jax.random.PRNGKey(0)
    k_emb, k_w1, k_wlm, k_ids = jax.random.split(key, 4)
    params = {
        "emb": jax.random.normal(k_emb, (V, H), jnp.float32) * 0.05,
        "w1":  jax.random.normal(k_w1, (H, H), jnp.float32) * 0.1,
        "b1":  jnp.zeros((1, H), jnp.float32),
        "wlm": jax.random.normal(k_wlm, (H, V), jnp.float32) * 0.1,
        "blm": jnp.zeros((1, V), jnp.float32),
    }

    # Synthetic verbalizer map already converted to token ids:
    #   task -> list over classes -> list of label-word token ids per class.
    label_word_ids = {
        "sentiment": [[10, 23], [47, 81], [99, 120]],   # C=3, W=2
        "topic":     [[5, 33, 64], [77, 90, 111]],      # C=2, W=3
    }
    assert all(i not in SPECIAL_IDS
               for ids in label_word_ids.values() for row in ids for i in row)

    input_ids = jax.random.randint(k_ids, (B, S), 4, V, dtype=jnp.int32)
    attention_mask = jnp.ones((B, S), jnp.int32).at[1, S - 2:].set(0)
    mask_token_ids = {
        "sentiment": jnp.array([3, 5], dtype=jnp.int32),
        "topic":     jnp.array([1, 4], dtype=jnp.int32),
    }

    out, mask_logits = multi_maskit_forward(params, input_ids, attention_mask,
                                            mask_token_ids, label_word_ids)
    out = jax.tree_util.tree_map(jax.block_until_ready, out)
    mask_logits = jax.block_until_ready(mask_logits)

    ref_out, ref_logits = ref_forward(params, input_ids, attention_mask,
                                      mask_token_ids, label_word_ids)

    # Backbone + LM-head path: kernel only materializes the mask-position rows.
    for ti, task in enumerate(label_word_ids):
        ref_rows = ref_logits[jnp.arange(B), mask_token_ids[task]]
        assert jnp.allclose(mask_logits[ti], ref_rows, atol=1e-4, rtol=1e-4)

    # Verbalizer outputs.
    for task in label_word_ids:
        assert out[task].shape == ref_out[task].shape
        assert jnp.allclose(out[task], ref_out[task], atol=1e-4, rtol=1e-4)

    print("KERNEL_OK")
</pallas_src>

<mosaic_0001>
module attributes {stable_mosaic.version = 11 : i64} {
  func.func @_matmul_bias_kernel(%arg0: i32, %arg1: i32, %arg2: i32, %arg3: memref<16x128xbf16, #tpu.memory_space<vmem>>, %arg4: memref<128x128xbf16, #tpu.memory_space<vmem>>, %arg5: memref<1x128xf32, #tpu.memory_space<vmem>>, %arg6: memref<16x128xf32, #tpu.memory_space<vmem>>, %arg7: memref<16x128xf32, #tpu.memory_space<vmem>>) attributes {dimension_semantics = [#tpu.dimension_semantics<parallel>, #tpu.dimension_semantics<parallel>, #tpu.dimension_semantics<arbitrary>], iteration_bounds = array<i64: 1, 1, 1>, scalar_prefetch = 0 : i64, scratch_operands = 1 : i64, tpu.core_type = #tpu.core_type<tc>, window_params = [{transform_indices = @transform_0, window_bounds = array<i64: 16, 128>}, {transform_indices = @transform_1, window_bounds = array<i64: 128, 128>}, {transform_indices = @transform_2, window_bounds = array<i64: 1, 128>}, {transform_indices = @transform_3, window_bounds = array<i64: 16, 128>}]} {
    %c0_i32 = arith.constant 0 : i32
    %0 = arith.cmpi eq, %arg2, %c0_i32 : i32
    %1 = arith.extui %0 : i1 to i32
    %c0_i32_0 = arith.constant 0 : i32
    %2 = arith.cmpi ne, %1, %c0_i32_0 : i32
    scf.if %2 {
      %cst_10 = arith.constant 0.000000e+00 : f32
      %12 = vector.broadcast %cst_10 : f32 to vector<16x128xf32>
      %c0_11 = arith.constant 0 : index
      %c0_12 = arith.constant 0 : index
      %13 = vector.load %arg7[%c0_11, %c0_12] : memref<16x128xf32, #tpu.memory_space<vmem>>, vector<16x128xf32>
      tpu.vector_store %arg7[%c0_11, %c0_12], %12 {strides = array<i32>} : memref<16x128xf32, #tpu.memory_space<vmem>>, vector<16x128xf32>,
    } else {
    }
    %c0 = arith.constant 0 : index
    %c0_1 = arith.constant 0 : index
    %3 = vector.load %arg7[%c0, %c0_1] : memref<16x128xf32, #tpu.memory_space<vmem>>, vector<16x128xf32>
    %c0_2 = arith.constant 0 : index
    %c0_3 = arith.constant 0 : index
    %4 = vector.load %arg3[%c0_2, %c0_3] : memref<16x128xbf16, #tpu.memory_space<vmem>>, vector<16x128xbf16>
    %c0_4 = arith.constant 0 : index
    %c0_5 = arith.constant 0 : index
    %5 = vector.load %arg4[%c0_4, %c0_5] : memref<128x128xbf16, #tpu.memory_space<vmem>>, vector<128x128xbf16>
    %cst = arith.constant dense<0.000000e+00> : vector<16x128xf32>
    %6 = tpu.matmul %4, %5, %cst {dimension_numbers = #tpu.dot_dimension_numbers<[1], [0], [0], [1], [0, 0, 1, 1], [], []>} : vector<16x128xbf16>, vector<128x128xbf16>, vector<16x128xf32> -> vector<16x128xf32>
    %7 = arith.addf %3, %6 : vector<16x128xf32>
    %c0_6 = arith.constant 0 : index
    %c0_7 = arith.constant 0 : index
    %8 = vector.load %arg7[%c0_6, %c0_7] : memref<16x128xf32, #tpu.memory_space<vmem>>, vector<16x128xf32>
    tpu.vector_store %arg7[%c0_6, %c0_7], %7 {strides = array<i32>} : memref<16x128xf32, #tpu.memory_space<vmem>>, vector<16x128xf32>,
    %c0_i32_8 = arith.constant 0 : i32
    %9 = arith.cmpi eq, %arg2, %c0_i32_8 : i32
    %10 = arith.extui %9 : i1 to i32
    %c0_i32_9 = arith.constant 0 : i32
    %11 = arith.cmpi ne, %10, %c0_i32_9 : i32
    scf.if %11 {
      %c0_10 = arith.constant 0 : index
      %c0_11 = arith.constant 0 : index
      %12 = vector.load %arg7[%c0_10, %c0_11] : memref<16x128xf32, #tpu.memory_space<vmem>>, vector<16x128xf32>
      %c0_12 = arith.constant 0 : index
      %c0_13 = arith.constant 0 : index
      %13 = vector.load %arg5[%c0_12, %c0_13] : memref<1x128xf32, #tpu.memory_space<vmem>>, vector<1x128xf32>
      %14 = vector.broadcast %13 : vector<1x128xf32> to vector<16x128xf32>
      %15 = arith.addf %12, %14 : vector<16x128xf32>
      %16 = arith.mulf %15, %15 : vector<16x128xf32>
      %17 = arith.mulf %15, %16 : vector<16x128xf32>
      %cst_14 = arith.constant 4.471500e-02 : f32
      %18 = vector.broadcast %cst_14 : f32 to vector<16x128xf32>
      %19 = arith.mulf %18, %17 : vector<16x128xf32>
      %20 = arith.addf %15, %19 : vector<16x128xf32>
      %cst_15 = arith.constant 0.797884583 : f32
      %21 = vector.broadcast %cst_15 : f32 to vector<16x128xf32>
      %22 = arith.mulf %21, %20 : vector<16x128xf32>
      %23 = math.tanh %22 : vector<16x128xf32>
      %cst_16 = arith.constant 1.000000e+00 : f32
      %24 = vector.broadcast %cst_16 : f32 to vector<16x128xf32>
      %25 = arith.addf %24, %23 : vector<16x128xf32>
      %cst_17 = arith.constant 5.000000e-01 : f32
      %26 = vector.broadcast %cst_17 : f32 to vector<16x128xf32>
      %27 = arith.mulf %26, %25 : vector<16x128xf32>
      %28 = arith.mulf %15, %27 : vector<16x128xf32>
      %c0_18 = arith.constant 0 : index
      %c0_19 = arith.constant 0 : index
      %29 = vector.load %arg6[%c0_18, %c0_19] : memref<16x128xf32, #tpu.memory_space<vmem>>, vector<16x128xf32>
      tpu.vector_store %arg6[%c0_18, %c0_19], %28 {strides = array<i32>} : memref<16x128xf32, #tpu.memory_space<vmem>>, vector<16x128xf32>,
    } else {
    }
    return
  }
  func.func @transform_0(%arg0: i32, %arg1: i32, %arg2: i32) -> (i32, i32) {
    %c0_i32 = arith.constant 0 : i32
    return %arg0, %arg2 : i32, i32
  }
  func.func @transform_1(%arg0: i32, %arg1: i32, %arg2: i32) -> (i32, i32) {
    %c0_i32 = arith.constant 0 : i32
    return %arg2, %arg1 : i32, i32
  }
  func.func @transform_2(%arg0: i32, %arg1: i32, %arg2: i32) -> (i32, i32) {
    %c0_i32 = arith.constant 0 : i32
    %c0_i32_0 = arith.constant 0 : i32
    return %c0_i32, %arg1 : i32, i32
  }
  func.func @transform_3(%arg0: i32, %arg1: i32, %arg2: i32) -> (i32, i32) {
    %c0_i32 = arith.constant 0 : i32
    return %arg0, %arg1 : i32, i32
  }
}

</mosaic_0001>

<bundles_post_ra>
// kernel: tpu_custom_call.1
= control target key start
LH: loop header
LB: loop body
LE: loop exit
PB: predicated region body
PF: predicated region fallthrough
CT: control target
= control target key end

     0   :  { %8 = vsyncpa [#allocation4], 0  ;;  %s422_s0 = inlined_call_operand.hbm [shape: bf16[16,128], index: 0, kind: input, shape index: {}]   ;;  %s423_s1 = inlined_call_operand.hbm [shape: bf16[128,128], index: 1, kind: input, shape index: {}]   ;;  %s424_s2 = inlined_call_operand.vmem [shape: f32[1,128], index: 2, kind: input, shape index: {}]   ;;  %s425_s3 = inlined_call_operand.hbm [shape: f32[16,128], index: 3, kind: output, shape index: {}]  }
   0x1   :  { %9 = vsyncpa [#allocation7], 0 }
   0x2   :  { %10 = vsyncpa [#allocation5], 0  ;;  %s354_s12 = smov [#allocation3]   ;;  %s282_s16 = scalar_lea.hbm %s422_s0, 128 }
   0x3   :  { %s16_s13 = sshll.u32 %s354_s12, 4  ;;  %p283_p0 = scmp.ne.s32.totalorder %s422_s0, %s282_s16  ;;  %s17_s13 = int_to_ptr.vmem [resolvable:$true] %s16_s13 }
   0x4   :  { %p286_p1 = scmp.lt.u32.totalorder %s282_s16, %s422_s0 }
   0x6   :  { %p288_p2 = pnand %p286_p1, %p283_p0 }
   0x8   :  { %291 = shalt.err (!%p288_p2)
}
   0x9   :  { %s292_s21 = scalar_lea.vmem %s17_s13, 128  ;;  %p297_p4 = scmp.lt.s32.totalorder %s17_s13, %s17_s13 }
   0xa   :  { %p293_p3 = scmp.ne.s32.totalorder %s17_s13, %s292_s21  ;;  %p298_p5 = scmp.lt.s32.totalorder %s292_s21, %s292_s21 }
   0xc   :  { %p299_p6 = por %p298_p5, %p297_p4 }
   0xe   :  { %p300_p7 = pnand %p299_p6, %p293_p3 }
  0x10   :  { %303 = shalt.err (!%p300_p7)
}
  0x11   :  { %s355_s22 = smov 64   ;;  %s356_s23 = smov 4  }
  0x12   :  { %22 = dma.hbm_to_vmem [thread:$0]  %s422_s0, 128, %s17_s13, [#allocation4], %s355_s22, %s355_s22, %s356_s23  }
  0x13   :  { %s357_s26 = smov [#allocation6]   ;;  %s304_s30 = scalar_lea.hbm %s423_s1, 1024 }
  0x14   :  { %s28_s27 = sshll.u32 %s357_s26, 4  ;;  %p305_p8 = scmp.ne.s32.totalorder %s423_s1, %s304_s30  ;;  %s29_s27 = int_to_ptr.vmem [resolvable:$true] %s28_s27 }
  0x15   :  { %p308_p9 = scmp.lt.u32.totalorder %s304_s30, %s423_s1 }
  0x17   :  { %p310_p10 = pnand %p308_p9, %p305_p8 }
  0x19   :  { %313 = shalt.err (!%p310_p10)
}
  0x1a   :  { %s314_s8 = scalar_lea.vmem %s29_s27, 1024  ;;  %p319_p12 = scmp.lt.s32.totalorder %s29_s27, %s29_s27 }
  0x1b   :  { %p315_p11 = scmp.ne.s32.totalorder %s29_s27, %s314_s8  ;;  %p320_p13 = scmp.lt.s32.totalorder %s314_s8, %s314_s8 }
  0x1d   :  { %p321_p0 = por %p320_p13, %p319_p12 }
  0x1f   :  { %p322_p1 = pnand %p321_p0, %p315_p11 }
  0x21   :  { %325 = shalt.err (!%p322_p1)
}
  0x22   :  { %34 = dma.hbm_to_vmem [thread:$0]  %s423_s1, 1024, %s29_s27, [#allocation7], %s355_s22, %s355_s22, %s356_s23  }
  0x23   :  { %348 = dma.done.wait [#allocation4], 128  }
  0x24   :  { %349 = vsyncadd [#allocation4], 4294967168 }
  0x25   :  { %350 = dma.done.wait [#allocation7], 1024  }
  0x26   :  { %351 = vsyncadd [#allocation7], 4294966272  ;;  %v358_v0 = vmov 0.0   ;;  %vm359_vm0 = vmmov 0   ;;  %v269_v1 = vld [vmem:[#allocation6] sm:$0xff]   ;;  %v270_v2 = vld [vmem:[#allocation6 + $0x8] sm:$0xff]  }
  0x27   :  { %240 = vmatprep.subr.bf16.mxu0 %v358_v0  ;;  %256 = vmatprep.mubr.msk.bf16.mxu0 %vm359_vm0, %v358_v0  ;;  %v271_v3 = vld [vmem:[#allocation6 + $0x10] sm:$0xff]   ;;  %v272_v4 = vld [vmem:[#allocation6 + $0x18] sm:$0xff]   ;;  %v273_v5 = vld [vmem:[#allocation6 + $0x20] sm:$0xff]  }
  0x28   :  { %241 = vmatpush3.bf16.msra.mxu0 %v269_v1  ;;  %v274_v6 = vld [vmem:[#allocation6 + $0x28] sm:$0xff]   ;;  %v275_v7 = vld [vmem:[#allocation6 + $0x30] sm:$0xff]   ;;  %v276_v8 = vld [vmem:[#allocation6 + $0x38] sm:$0xff]  }
  0x29   :  { %242 = vmatprep.subr.bf16.mxu0 %v358_v0  ;;  %v277_v9 = vld [vmem:[#allocation3] sm:$0xff]  }
  0x2a   :  { %v230_v10 = vld [vmem:[%s424_s2] ss:$0 sm:$0xff]  ;;  %s360_s2 = smov [#allocation8]  }
  0x2b   :  { %s208_s11 = sshll.u32 %s360_s2, 4  ;;  %s209_s11 = int_to_ptr.vmem [resolvable:$true] %s208_s11 }
  0x2c   :  { %243 = vmatpush3.bf16.msra.mxu0 %v270_v2  ;;  %s326_s12 = scalar_lea.vmem %s209_s11, 256  ;;  %p331_p3 = scmp.lt.s32.totalorder %s209_s11, %s209_s11 }
  0x2d   :  { %244 = vmatprep.subr.bf16.mxu0 %v358_v0  ;;  %p327_p2 = scmp.ne.s32.totalorder %s209_s11, %s326_s12  ;;  %p332_p4 = scmp.lt.s32.totalorder %s326_s12, %s326_s12 }
  0x2f   :  { %p333_p5 = por %p332_p4, %p331_p3 }
  0x30   :  { %245 = vmatpush3.bf16.msra.mxu0 %v271_v3 }
  0x31   :  { %246 = vmatprep.subr.bf16.mxu0 %v358_v0  ;;  %p334_p6 = pnand %p333_p5, %p327_p2 }
  0x34   :  { %247 = vmatpush3.bf16.msra.mxu0 %v272_v4 }
  0x35   :  { %248 = vmatprep.subr.bf16.mxu0 %v358_v0 }
  0x38   :  { %249 = vmatpush3.bf16.msra.mxu0 %v273_v5 }
  0x39   :  { %250 = vmatprep.subr.bf16.mxu0 %v358_v0 }
  0x3c   :  { %251 = vmatpush3.bf16.msra.mxu0 %v274_v6 }
  0x3d   :  { %252 = vmatprep.subr.bf16.mxu0 %v358_v0 }
  0x40   :  { %253 = vmatpush3.bf16.msra.mxu0 %v275_v7 }
  0x41   :  { %254 = vmatprep.subr.bf16.mxu0 %v358_v0 }
  0x44   :  { %255 = vmatpush3.bf16.msra.mxu0 %v276_v8 }
  0x47   :  { %257 = vmatmul.mubr.bf16.vlgmr.msra.gmra.mrb[0].mxu0 %v277_v9 }
 0x11a   :  { %v158_v11 = vpop.f32.mrb[0].mxu0 }
 0x11b   :  { %v181_v12 = vadd.f32 %v230_v10, %v158_v11  ;;  %v258_v13 = vpop.f32.mrb[1].mxu0 }
 0x11c   :  { %v161_v14 = vpop.f32.mrb[2].mxu0 }
 0x11d   :  { %v183_v15 = vmul.f32 %v181_v12, %v181_v12  ;;  %v182_v16 = vadd.f32 %v230_v10, %v161_v14  ;;  %v259_v17 = vpop.f32.mrb[3].mxu0 }
 0x11f   :  { %v185_v18 = vmul.f32 %v183_v15, %v181_v12  ;;  %v184_v19 = vmul.f32 %v182_v16, %v182_v16 }
 0x121   :  { %v187_v20 = vmul.f32 0.044715, %v185_v18  ;;  %v186_v21 = vmul.f32 %v184_v19, %v182_v16 }
 0x123   :  { %v189_v22 = vadd.f32 %v187_v20, %v181_v12  ;;  %v188_v23 = vmul.f32 0.044715, %v186_v21 }
 0x125   :  { %v191_v24 = vmul.f32 0.7978846, %v189_v22  ;;  %v190_v25 = vadd.f32 %v188_v23, %v182_v16 }
 0x127   :  { %278 = vtanh.f32 %v191_v24  ;;  %v192_v26 = vmul.f32 0.7978846, %v190_v25 }
 0x129   :  { %280 = vtanh.f32 %v192_v26 }
 0x131   :  { %v279_v27 = vpop.eup %278 }
 0x132   :  { %v195_v28 = vadd.f32 1.0, %v279_v27 }
 0x133   :  { %v281_v29 = vpop.eup %280 }
 0x134   :  { %v197_v30 = vmul.f32 0.5, %v195_v28  ;;  %v196_v31 = vadd.f32 1.0, %v281_v29 }
 0x136   :  { %v199_v32 = vmul.f32 %v197_v30, %v181_v12  ;;  %v198_v33 = vmul.f32 0.5, %v196_v31 }
 0x138   :  { %201 = vst [vmem:[#allocation8] sm:$0xff] %v199_v32  ;;  %v200_v34 = vmul.f32 %v198_v33, %v182_v16 }
 0x13a   :  { %202 = vst [vmem:[#allocation8 + $0x8] sm:$0xff] %v200_v34 }
 0x13b   :  { %337 = shalt.err (!%p334_p6)
}
 0x13c   :  { %s338_s15 = scalar_lea.hbm %s425_s3, 256 }
 0x13d   :  { %p339_p7 = scmp.ne.s32.totalorder %s425_s3, %s338_s15  ;;  %p342_p8 = scmp.lt.u32.totalorder %s338_s15, %s425_s3 }
 0x13f   :  { %p344_p9 = pnand %p342_p8, %p339_p7 }
 0x141   :  { %347 = shalt.err (!%p344_p9)
}
 0x142   :  { %s361_s20 = smov 128   ;;  %s362_s21 = smov 8  }
 0x143   :  { %214 = dma.vmem_to_hbm [thread:$0]  %s209_s11, 256, %s425_s3, [#allocation5], %s361_s20, %s361_s20, %s362_s21  }
 0x144   :  { %352 = dma.done.wait [#allocation5], 256  }
 0x145   :  { %353 = vsyncadd [#allocation5], 4294967040 }
 0x146   :  { %218 = vsyncpa [#allocation4], 1 }
 0x147   :  { %219 = vsyncpa [#allocation7], 1 }
 0x148   :  { %220 = vsyncpa [#allocation5], 1 }

</bundles_post_ra>
